<compile_context>
chip_gen: v7x
topology: tpu7x:2x2x1
jax: 0.10.0
libtpu: 0.0.40
codegen_flags: <defaults>
</compile_context>

<pallas_src>
import math

import jax
import jax.numpy as jnp
from jax.experimental import pallas as pl
from jax.experimental.pallas import tpu as pltpu


# ----------------------------------------------------------------------------
# Fused kernel:  out = y * sigmoid(y @ W2 + b2),   y = x @ W1 + b1
# ----------------------------------------------------------------------------

def _geu_kernel(x_ref, w1_ref, b1_ref, w2_ref, b2_ref, o_ref):
    # x_ref : (TM, Din)   streaming batch-row tile
    # w1_ref: (Din, Dp)   fc weight, resident in VMEM across the grid
    # b1_ref: (1, Dp)
    # w2_ref: (Dp, Dp)    context-gating weight, resident
    # b2_ref: (1, Dp)
    # o_ref : (TM, Dp)
    y = jnp.dot(x_ref[...], w1_ref[...], preferred_element_type=jnp.float32)
    y = y + b1_ref[...]
    g = jnp.dot(y, w2_ref[...], preferred_element_type=jnp.float32)
    g = g + b2_ref[...]
    # sigmoid via EUP exp; exp(-g) overflowing to +inf gives exactly 0.0 (the
    # correct limit), so this is NaN-free.
    gate = 1.0 / (1.0 + jnp.exp(-g))
    o_ref[...] = y * gate


# ----------------------------------------------------------------------------
# Wrapper
# ----------------------------------------------------------------------------

def _round_up(v, m):
    return ((v + m - 1) // m) * m


def _pick_tm(m, din, dp, vmem_budget_bytes=20 * 1024 * 1024):
    """Largest row tile s.t. double-buffered x / out tiles fit the budget."""
    per_row = 4 * 2 * (din + dp)              # f32, double-buffered in & out
    tm = max(8, min(1024, vmem_budget_bytes // max(per_row, 1)))
    tm = (tm // 8) * 8                        # sublane-aligned
    if m <= tm:
        return m, 1                           # single full-extent block
    return tm, pl.cdiv(m, tm)                 # edge block handled by Pallas


def gated_embedding_unit(x, w1, b1, w2, b2):
    """x: [M, Din] f32.  w1: [Dout, Din], b1: [Dout], w2: [Dout, Dout],
    b2: [Dout]  (PyTorch nn.Linear layout).  Returns [M, Dout] f32."""
    m, din = x.shape
    dout = w1.shape[0]

    # Pad the feature dim to a lane-dense multiple of 128 (weights/bias only —
    # tiny arrays).  Padded W1 columns / b1 entries are zero => padded y columns
    # are zero; padded W2 rows are zero => no contribution to the real gates.
    dp = _round_up(max(dout, 128), 128)
    w1m = jnp.pad(jnp.transpose(w1).astype(jnp.float32), ((0, 0), (0, dp - dout)))
    b1m = jnp.pad(b1.astype(jnp.float32), (0, dp - dout)).reshape(1, dp)
    w2m = jnp.pad(jnp.transpose(w2).astype(jnp.float32),
                  ((0, dp - dout), (0, dp - dout)))
    b2m = jnp.pad(b2.astype(jnp.float32), (0, dp - dout)).reshape(1, dp)
    x = x.astype(jnp.float32)

    tm, grid_m = _pick_tm(m, din, dp)
    # TODO(synk): for very large Din/Dout (weights >> VMEM) add K/N grid axes
    # with an accumulator instead of keeping the full weights resident.

    flops = 2 * m * din * dp + 2 * m * dp * dp + 4 * m * dp
    bytes_accessed = 4 * (m * din + din * dp + dp * dp + 2 * dp + m * dp)

    out = pl.pallas_call(
        _geu_kernel,
        out_shape=jax.ShapeDtypeStruct((m, dp), jnp.float32),
        grid=(grid_m,),
        in_specs=[
            pl.BlockSpec((tm, din), lambda i: (i, 0)),   # x tile (streams)
            pl.BlockSpec((din, dp), lambda i: (0, 0)),   # W1 (resident)
            pl.BlockSpec((1, dp),   lambda i: (0, 0)),   # b1
            pl.BlockSpec((dp, dp),  lambda i: (0, 0)),   # W2 (resident)
            pl.BlockSpec((1, dp),   lambda i: (0, 0)),   # b2
        ],
        out_specs=pl.BlockSpec((tm, dp), lambda i: (i, 0)),
        compiler_params=pltpu.CompilerParams(
            dimension_semantics=("parallel",),
            vmem_limit_bytes=48 * 1024 * 1024,
        ),
        cost_estimate=pl.CostEstimate(
            flops=flops, transcendentals=m * dp, bytes_accessed=bytes_accessed),
    )(x, w1m, b1m, w2m, b2m)

    return out[:, :dout]


# ----------------------------------------------------------------------------
# Module mirror (deterministic params) + pure-JAX reference
# ----------------------------------------------------------------------------

class GatedEmbeddingUnit:
    def __init__(self, input_dimension, output_dimension, key=None):
        key = jax.random.PRNGKey(0) if key is None else key
        k1, k2, k3, k4 = jax.random.split(key, 4)
        bound1 = 1.0 / math.sqrt(input_dimension)
        self.w1 = jax.random.uniform(k1, (output_dimension, input_dimension),
                                     jnp.float32, -bound1, bound1)
        self.b1 = jax.random.uniform(k2, (output_dimension,), jnp.float32,
                                     -bound1, bound1)
        bound2 = 1.0 / math.sqrt(output_dimension)
        self.w2 = jax.random.uniform(k3, (output_dimension, output_dimension),
                                     jnp.float32, -bound2, bound2)
        self.b2 = jax.random.uniform(k4, (output_dimension,), jnp.float32,
                                     -bound2, bound2)

    def __call__(self, x):
        return gated_embedding_unit(x, self.w1, self.b1, self.w2, self.b2)


def reference_geu(x, w1, b1, w2, b2):
    y = x @ w1.T + b1
    g = y @ w2.T + b2
    return y * jax.nn.sigmoid(g)


# ----------------------------------------------------------------------------
# Main
# ----------------------------------------------------------------------------

if __name__ == "__main__":
    key = jax.random.PRNGKey(0)
    # (batch, input_dim, output_dim):
    #  1) tiny, non-aligned dims  -> exercises lane padding & full-extent block
    #  2) typical GEU-ish dims    -> single big tile, lane-aligned
    #  3) large batch, odd count  -> multi-tile grid with pl.cdiv edge block
    configs = [(2, 32, 32), (200, 384, 256), (3000, 128, 128)]
    for (batch, din, dout) in configs:
        kcfg = jax.random.fold_in(key, batch * 7919 + din)
        kx, kp = jax.random.split(kcfg)
        x = jax.random.normal(kx, (batch, din), dtype=jnp.float32)
        mod = GatedEmbeddingUnit(din, dout, key=kp)

        out = jax.block_until_ready(mod(x))
        ref = reference_geu(x, mod.w1, mod.b1, mod.w2, mod.b2)

        assert out.shape == (batch, dout), out.shape
        assert bool(jnp.all(jnp.isfinite(out)))
        err = float(jnp.max(jnp.abs(out - ref)))
        assert bool(jnp.allclose(out, ref, atol=1e-4, rtol=1e-4)), err

    print("KERNEL_OK")
</pallas_src>

<mosaic_0001>
module attributes {stable_mosaic.version = 11 : i64} {
  func.func @_geu_kernel(%arg0: i32, %arg1: memref<2x32xf32, #tpu.memory_space<vmem>>, %arg2: memref<32x128xf32, #tpu.memory_space<vmem>>, %arg3: memref<1x128xf32, #tpu.memory_space<vmem>>, %arg4: memref<128x128xf32, #tpu.memory_space<vmem>>, %arg5: memref<1x128xf32, #tpu.memory_space<vmem>>, %arg6: memref<2x128xf32, #tpu.memory_space<vmem>>) attributes {dimension_semantics = [#tpu.dimension_semantics<parallel>], iteration_bounds = array<i64: 1>, scalar_prefetch = 0 : i64, scratch_operands = 0 : i64, tpu.core_type = #tpu.core_type<tc>, window_params = [{transform_indices = @transform_0, window_bounds = array<i64: 2, 32>}, {pipeline_mode = #tpu.pipeline_mode<synchronous>, transform_indices = @transform_1, window_bounds = array<i64: 32, 128>}, {pipeline_mode = #tpu.pipeline_mode<synchronous>, transform_indices = @transform_2, window_bounds = array<i64: 1, 128>}, {pipeline_mode = #tpu.pipeline_mode<synchronous>, transform_indices = @transform_3, window_bounds = array<i64: 128, 128>}, {pipeline_mode = #tpu.pipeline_mode<synchronous>, transform_indices = @transform_4, window_bounds = array<i64: 1, 128>}, {transform_indices = @transform_5, window_bounds = array<i64: 2, 128>}]} {
    %c0 = arith.constant 0 : index
    %c0_0 = arith.constant 0 : index
    %0 = vector.load %arg1[%c0, %c0_0] : memref<2x32xf32, #tpu.memory_space<vmem>>, vector<2x32xf32>
    %c0_1 = arith.constant 0 : index
    %c0_2 = arith.constant 0 : index
    %1 = vector.load %arg2[%c0_1, %c0_2] : memref<32x128xf32, #tpu.memory_space<vmem>>, vector<32x128xf32>
    %cst = arith.constant dense<0.000000e+00> : vector<2x128xf32>
    %2 = tpu.matmul %0, %1, %cst {dimension_numbers = #tpu.dot_dimension_numbers<[1], [0], [0], [1], [0, 0, 1, 1], [], []>} : vector<2x32xf32>, vector<32x128xf32>, vector<2x128xf32> -> vector<2x128xf32>
    %c0_3 = arith.constant 0 : index
    %c0_4 = arith.constant 0 : index
    %3 = vector.load %arg3[%c0_3, %c0_4] : memref<1x128xf32, #tpu.memory_space<vmem>>, vector<1x128xf32>
    %4 = vector.broadcast %3 : vector<1x128xf32> to vector<2x128xf32>
    %5 = arith.addf %2, %4 : vector<2x128xf32>
    %c0_5 = arith.constant 0 : index
    %c0_6 = arith.constant 0 : index
    %6 = vector.load %arg4[%c0_5, %c0_6] : memref<128x128xf32, #tpu.memory_space<vmem>>, vector<128x128xf32>
    %cst_7 = arith.constant dense<0.000000e+00> : vector<2x128xf32>
    %7 = tpu.matmul %5, %6, %cst_7 {dimension_numbers = #tpu.dot_dimension_numbers<[1], [0], [0], [1], [0, 0, 1, 1], [], []>} : vector<2x128xf32>, vector<128x128xf32>, vector<2x128xf32> -> vector<2x128xf32>
    %c0_8 = arith.constant 0 : index
    %c0_9 = arith.constant 0 : index
    %8 = vector.load %arg5[%c0_8, %c0_9] : memref<1x128xf32, #tpu.memory_space<vmem>>, vector<1x128xf32>
    %9 = vector.broadcast %8 : vector<1x128xf32> to vector<2x128xf32>
    %10 = arith.addf %7, %9 : vector<2x128xf32>
    %cst_10 = arith.constant 0.000000e+00 : f32
    %11 = vector.broadcast %cst_10 : f32 to vector<2x128xf32>
    %12 = arith.subf %11, %10 : vector<2x128xf32>
    %13 = math.exp %12 : vector<2x128xf32>
    %cst_11 = arith.constant 1.000000e+00 : f32
    %14 = vector.broadcast %cst_11 : f32 to vector<2x128xf32>
    %15 = arith.addf %14, %13 : vector<2x128xf32>
    %cst_12 = arith.constant 1.000000e+00 : f32
    %16 = vector.broadcast %cst_12 : f32 to vector<2x128xf32>
    %17 = arith.divf %16, %15 : vector<2x128xf32>
    %18 = arith.mulf %5, %17 : vector<2x128xf32>
    %c0_13 = arith.constant 0 : index
    %c0_14 = arith.constant 0 : index
    %19 = vector.load %arg6[%c0_13, %c0_14] : memref<2x128xf32, #tpu.memory_space<vmem>>, vector<2x128xf32>
    tpu.vector_store %arg6[%c0_13, %c0_14], %18 {strides = array<i32>} : memref<2x128xf32, #tpu.memory_space<vmem>>, vector<2x128xf32>,
    return
  }
  func.func @transform_0(%arg0: i32) -> (i32, i32) {
    %c0_i32 = arith.constant 0 : i32
    %c0_i32_0 = arith.constant 0 : i32
    return %arg0, %c0_i32 : i32, i32
  }
  func.func @transform_1(%arg0: i32) -> (i32, i32) {
    %c0_i32 = arith.constant 0 : i32
    %c0_i32_0 = arith.constant 0 : i32
    %c0_i32_1 = arith.constant 0 : i32
    return %c0_i32, %c0_i32_0 : i32, i32
  }
  func.func @transform_2(%arg0: i32) -> (i32, i32) {
    %c0_i32 = arith.constant 0 : i32
    %c0_i32_0 = arith.constant 0 : i32
    %c0_i32_1 = arith.constant 0 : i32
    return %c0_i32, %c0_i32_0 : i32, i32
  }
  func.func @transform_3(%arg0: i32) -> (i32, i32) {
    %c0_i32 = arith.constant 0 : i32
    %c0_i32_0 = arith.constant 0 : i32
    %c0_i32_1 = arith.constant 0 : i32
    return %c0_i32, %c0_i32_0 : i32, i32
  }
  func.func @transform_4(%arg0: i32) -> (i32, i32) {
    %c0_i32 = arith.constant 0 : i32
    %c0_i32_0 = arith.constant 0 : i32
    %c0_i32_1 = arith.constant 0 : i32
    return %c0_i32, %c0_i32_0 : i32, i32
  }
  func.func @transform_5(%arg0: i32) -> (i32, i32) {
    %c0_i32 = arith.constant 0 : i32
    %c0_i32_0 = arith.constant 0 : i32
    return %arg0, %c0_i32 : i32, i32
  }
}

</mosaic_0001>

<bundles_post_ra>
// kernel: tpu_custom_call.1
= control target key start
LH: loop header
LB: loop body
LE: loop exit
PB: predicated region body
PF: predicated region fallthrough
CT: control target
= control target key end

     0   :  { %10 = vsyncpa [#allocation3], 0  ;;  %s570_s0 = inlined_call_operand.hbm [shape: f32[2,32], index: 0, kind: input, shape index: {}]   ;;  %s571_s1 = inlined_call_operand.hbm [shape: f32[32,128], index: 1, kind: input, shape index: {}]   ;;  %s572_s2 = inlined_call_operand.vmem [shape: f32[1,128], index: 2, kind: input, shape index: {}]   ;;  %s573_s3 = inlined_call_operand.hbm [shape: f32[128,128], index: 3, kind: input, shape index: {}]   ;;  %s574_s4 = inlined_call_operand.vmem [shape: f32[1,128], index: 4, kind: input, shape index: {}]   ;;  %s575_s5 = inlined_call_operand.hbm [shape: f32[2,128], index: 5, kind: output, shape index: {}]  }
   0x1   :  { %11 = vsyncpa [#allocation6], 0 }
   0x2   :  { %12 = vsyncpa [#allocation4], 0  ;;  %s471_s18 = smov [#allocation5]   ;;  %s377_s22 = scalar_lea.hbm %s571_s1, 512 }
   0x3   :  { %s28_s19 = sshll.u32 %s471_s18, 4  ;;  %p378_p0 = scmp.ne.s32.totalorder %s571_s1, %s377_s22  ;;  %s29_s19 = int_to_ptr.vmem [resolvable:$true] %s28_s19 }
   0x4   :  { %p381_p1 = scmp.lt.u32.totalorder %s377_s22, %s571_s1 }
   0x6   :  { %p383_p2 = pnand %p381_p1, %p378_p0 }
   0x8   :  { %386 = shalt.err (!%p383_p2)
}
   0x9   :  { %s387_s27 = scalar_lea.vmem %s29_s19, 512  ;;  %p392_p4 = scmp.lt.s32.totalorder %s29_s19, %s29_s19 }
   0xa   :  { %p388_p3 = scmp.ne.s32.totalorder %s29_s19, %s387_s27  ;;  %p393_p5 = scmp.lt.s32.totalorder %s387_s27, %s387_s27 }
   0xc   :  { %p394_p6 = por %p393_p5, %p392_p4 }
   0xe   :  { %p395_p7 = pnand %p394_p6, %p388_p3 }
  0x10   :  { %398 = shalt.err (!%p395_p7)
}
  0x11   :  { %s472_s28 = smov 128   ;;  %s473_s29 = smov 8  }
  0x12   :  { %34 = dma.hbm_to_vmem [thread:$0]  %s571_s1, 512, %s29_s19, [#allocation6], %s472_s28, %s472_s28, %s473_s29  }
  0x13   :  { %s474_s7 = smov [#allocation2]   ;;  %s475_s9 = smov [#allocation7]  }
  0x14   :  { %s19_s8 = sshll.u32 %s474_s7, 4  ;;  %s42_s10 = sshll.u32 %s475_s9, 4  ;;  %s20_s8 = int_to_ptr.vmem [resolvable:$true] %s19_s8  ;;  %s43_s10 = int_to_ptr.vmem [resolvable:$true] %s42_s10 }
  0x15   :  { %s399_s13 = scalar_lea.hbm %s570_s0, 32 }
  0x16   :  { %p400_p8 = scmp.ne.s32.totalorder %s570_s0, %s399_s13  ;;  %p403_p9 = scmp.lt.u32.totalorder %s399_s13, %s570_s0 }
  0x18   :  { %p405_p10 = pnand %p403_p9, %p400_p8 }
  0x1a   :  { %408 = shalt.err (!%p405_p10)
}
  0x1b   :  { %s409_s1 = scalar_lea.vmem %s20_s8, 32  ;;  %p414_p12 = scmp.lt.s32.totalorder %s20_s8, %s20_s8 }
  0x1c   :  { %p410_p11 = scmp.ne.s32.totalorder %s20_s8, %s409_s1  ;;  %p415_p13 = scmp.lt.s32.totalorder %s409_s1, %s409_s1 }
  0x1e   :  { %p416_p0 = por %p415_p13, %p414_p12 }
  0x20   :  { %p417_p1 = pnand %p416_p0, %p410_p11 }
  0x22   :  { %420 = shalt.err (!%p417_p1)
}
  0x23   :  { %22 = dma.hbm_to_vmem [thread:$0]  %s570_s0, 32, %s20_s8, [#allocation3]  }
  0x24   :  { %s421_s22 = scalar_lea.hbm %s573_s3, 2048 }
  0x25   :  { %p422_p2 = scmp.ne.s32.totalorder %s573_s3, %s421_s22  ;;  %p425_p3 = scmp.lt.u32.totalorder %s421_s22, %s573_s3 }
  0x27   :  { %p427_p4 = pnand %p425_p3, %p422_p2 }
  0x29   :  { %430 = shalt.err (!%p427_p4)
}
  0x2a   :  { %s431_s27 = scalar_lea.vmem %s43_s10, 2048  ;;  %p436_p6 = scmp.lt.s32.totalorder %s43_s10, %s43_s10 }
  0x2b   :  { %p432_p5 = scmp.ne.s32.totalorder %s43_s10, %s431_s27  ;;  %p437_p7 = scmp.lt.s32.totalorder %s431_s27, %s431_s27 }
  0x2d   :  { %p438_p8 = por %p437_p7, %p436_p6 }
  0x2f   :  { %p439_p9 = pnand %p438_p8, %p432_p5 }
  0x31   :  { %442 = shalt.err (!%p439_p9)
}
  0x32   :  { %48 = dma.hbm_to_vmem [thread:$0]  %s573_s3, 2048, %s43_s10, [#allocation6], %s472_s28, %s472_s28, %s473_s29  }
  0x33   :  { %465 = dma.done.wait [#allocation3], 32  }
  0x34   :  { %466 = vsyncadd [#allocation3], 4294967264 }
  0x35   :  { %467 = dma.done.wait [#allocation6], 2560  }
  0x36   :  { %468 = vsyncadd [#allocation6], 4294964736  ;;  %v476_v0 = vmov 0.0|0.0   ;;  %vm477_vm0 = vmmov 0   ;;  %v478_v1 = vmov 0.0   ;;  %v61_v2 = vld [vmem:[#allocation5] sm:$0xff] }
  0x37   :  { %334 = vmatprep.subr.bf16.mxu0 %v476_v0  ;;  %296 = vmatprep.mubr.msk.f32.mxu0 %vm477_vm0, %v478_v1  ;;  %v62_v3 = vld [vmem:[#allocation5 + $0x8] sm:$0xff]  ;;  %v63_v4 = vld [vmem:[#allocation5 + $0x10] sm:$0xff]  ;;  %v64_v6 = vld [vmem:[#allocation5 + $0x18] sm:$0xff]  ;;  %vm72_vm1 = vcmask 261120   ;;  %s479_s7 = smov [#allocation8]  }
  0x38   :  { %340 = vmatprep.subr.bf16.mxu1 %v476_v0  ;;  %331 = vmatprep.mubr.msk.f32.mxu1 %vm477_vm0, %v478_v1  ;;  %v335_v5 = vpack.c.bf16 %v62_v3, %v61_v2  ;;  %v146_v7 = vld [vmem:[#allocation7] sm:$0xff]  ;;  %v147_v8 = vld [vmem:[#allocation7 + $0x8] sm:$0xff]  ;;  %v148_v9 = vld [vmem:[#allocation7 + $0x10] sm:$0xff]  ;;  %v338_v11 = vpack.c.bf16 %v64_v6, %v63_v4  ;;  %s253_s8 = sshll.u32 %s479_s7, 4  ;;  %s254_s8 = int_to_ptr.vmem [resolvable:$true] %s253_s8 }
  0x39   :  { %v149_v10 = vld [vmem:[#allocation7 + $0x18] sm:$0xff]  ;;  %v341_v12 = vpack.c.bf16 %v147_v8, %v146_v7  ;;  %v150_v14 = vld [vmem:[#allocation7 + $0x20] sm:$0xff]  ;;  %v151_v15 = vld [vmem:[#allocation7 + $0x28] sm:$0xff]  ;;  %p448_p11 = scmp.lt.s32.totalorder %s254_s8, %s254_s8 }
  0x3a   :  { %336 = vmatpush3.bf16.msra.mxu0 %v335_v5  ;;  %v344_v13 = vpack.c.bf16 %v149_v10, %v148_v9  ;;  %v60_v16 = vld [vmem:[#allocation2] sm:$0x3]  ;;  %v347_v17 = vpack.c.bf16 %v151_v15, %v150_v14  ;;  %v152_v18 = vld [vmem:[#allocation7 + $0x30] sm:$0xff]  ;;  %v154_v21 = vld [vmem:[#allocation7 + $0x40] sm:$0xff] }
  0x3b   :  { %337 = vmatprep.subr.bf16.mxu0 %v476_v0  ;;  %342 = vmatpush3.bf16.msra.mxu1 %v341_v12  ;;  %v153_v19 = vld [vmem:[#allocation7 + $0x38] sm:$0xff]  ;;  %v155_v22 = vld [vmem:[#allocation7 + $0x48] sm:$0xff]  ;;  %v156_v24 = vld [vmem:[#allocation7 + $0x50] sm:$0xff] }
  0x3c   :  { %343 = vmatprep.subr.bf16.mxu1 %v476_v0  ;;  %v350_v20 = vpack.c.bf16 %v153_v19, %v152_v18  ;;  %v353_v23 = vpack.c.bf16 %v155_v22, %v154_v21  ;;  %v157_v25 = vld [vmem:[#allocation7 + $0x58] sm:$0xff]  ;;  %v158_v27 = vld [vmem:[#allocation7 + $0x60] sm:$0xff]  ;;  %v159_v28 = vld [vmem:[#allocation7 + $0x68] sm:$0xff] }
  0x3d   :  { %v356_v26 = vpack.c.bf16 %v157_v25, %v156_v24  ;;  %v359_v29 = vpack.c.bf16 %v159_v28, %v158_v27  ;;  %v160_v30 = vld [vmem:[#allocation7 + $0x70] sm:$0xff]  ;;  %v161_v31 = vld [vmem:[#allocation7 + $0x78] sm:$0xff] }
  0x3e   :  { %339 = vmatpush3.bf16.msra.mxu0 %v338_v11  ;;  %v362_v32 = vpack.c.bf16 %v161_v31, %v160_v30  ;;  %v263_v33 = vld [vmem:[%s572_s2] ss:$0 sm:$0xff]  ;;  %s443_s2 = scalar_lea.vmem %s254_s8, 32 }
  0x3f   :  { %345 = vmatpush3.bf16.msra.mxu1 %v344_v13  ;;  %v265_v37 = vld [vmem:[%s574_s4] ss:$0 sm:$0xff]  ;;  %p444_p10 = scmp.ne.s32.totalorder %s254_s8, %s443_s2  ;;  %p449_p12 = scmp.lt.s32.totalorder %s443_s2, %s443_s2 }
  0x40   :  { %346 = vmatprep.subr.bf16.mxu1 %v476_v0 }
  0x41   :  { %297 = vmatmul.mubr.msk.f32.vlgmr.msra.gmra.mrb[0].mxu0 %vm72_vm1, %v60_v16  ;;  %p450_p13 = por %p449_p12, %p448_p11 }
  0x43   :  { %348 = vmatpush3.bf16.msra.mxu1 %v347_v17  ;;  %p451_p0 = pnand %p450_p13, %p444_p10 }
  0x44   :  { %349 = vmatprep.subr.bf16.mxu1 %v476_v0 }
  0x47   :  { %351 = vmatpush3.bf16.msra.mxu1 %v350_v20 }
  0x48   :  { %352 = vmatprep.subr.bf16.mxu1 %v476_v0 }
  0x4b   :  { %354 = vmatpush3.bf16.msra.mxu1 %v353_v23 }
  0x4c   :  { %355 = vmatprep.subr.bf16.mxu1 %v476_v0 }
  0x4f   :  { %357 = vmatpush3.bf16.msra.mxu1 %v356_v26 }
  0x50   :  { %358 = vmatprep.subr.bf16.mxu1 %v476_v0 }
  0x53   :  { %360 = vmatpush3.bf16.msra.mxu1 %v359_v29 }
  0x54   :  { %361 = vmatprep.subr.bf16.mxu1 %v476_v0 }
  0x57   :  { %363 = vmatpush3.bf16.msra.mxu1 %v362_v32 }
 0x114   :  { %v142_v34 = vpop.f32.mrb[0].mxu0 }
 0x115   :  { %v143_v35 = vadd.f32 %v263_v33, %v142_v34  ;;  %v298_v36 = vpop.f32.mrb[1].mxu0 }
 0x117   :  { %332 = vmatmul.mubr.f32.vlgmr.msra.gmra.mrb[0].mxu1 %v143_v35 }
 0x1ea   :  { %v235_v38 = vpop.f32.mrb[0].mxu1 }
 0x1eb   :  { %v236_v39 = vadd.f32 %v265_v37, %v235_v38  ;;  %v333_v40 = vpop.f32.mrb[1].mxu1 }
 0x1ed   :  { %v239_v41 = vsub.f32 0.0, %v236_v39 }
 0x1ef   :  { %v240_v42 = vmul.f32 1.442695, %v239_v41 }
 0x1f1   :  { %373 = vpow2.f32 %v240_v42 }
 0x1fb   :  { %v374_v43 = vpop.eup %373 }
 0x1fc   :  { %v242_v44 = vadd.f32 1.0, %v374_v43 }
 0x1fe   :  { %375 = vrcp.f32 %v242_v44 }
 0x208   :  { %v376_v45 = vpop.eup %375 }
 0x209   :  { %v245_v46 = vmul.f32 %v376_v45, %v143_v35 }
 0x20b   :  { %246 = vst [vmem:[#allocation8] sm:$0x3] %v245_v46 }
 0x20c   :  { %454 = shalt.err (!%p451_p0)
}
 0x20d   :  { %s455_s10 = scalar_lea.hbm %s575_s5, 32 }
 0x20e   :  { %p456_p1 = scmp.ne.s32.totalorder %s575_s5, %s455_s10  ;;  %p459_p2 = scmp.lt.u32.totalorder %s455_s10, %s575_s5 }
 0x210   :  { %p461_p3 = pnand %p459_p2, %p456_p1 }
 0x212   :  { %464 = shalt.err (!%p461_p3)
}
 0x213   :  { %256 = dma.vmem_to_hbm [thread:$0]  %s254_s8, 32, %s575_s5, [#allocation4]  }
 0x214   :  { %469 = dma.done.wait [#allocation4], 32  }
 0x215   :  { %470 = vsyncadd [#allocation4], 4294967264 }
 0x216   :  { %260 = vsyncpa [#allocation3], 1 }
 0x217   :  { %261 = vsyncpa [#allocation6], 1 }
 0x218   :  { %262 = vsyncpa [#allocation4], 1 }

</bundles_post_ra>
